<compile_context>
chip_gen: v6e
topology: v6e:2x2x1
jax: 0.10.0
libtpu: 0.0.40
codegen_flags: <defaults>
</compile_context>

<pallas_src>
import functools

import jax
import jax.numpy as jnp
from jax import lax
from jax.experimental import pallas as pl
from jax.experimental.pallas import tpu as pltpu

_LANE = 128
_SUB = 8
_TILE = _SUB * _LANE  # 1024


def _num_tensorcores():
    """Best-effort: 2 on multi-TensorCore chips (v7x), 1 otherwise."""
    try:
        info = pltpu.get_tpu_info()
        for attr in ("num_tensorcores", "tensorcores_per_chip", "num_cores",
                     "cores_per_chip", "core_count"):
            v = getattr(info, attr, None)
            if v is None:
                continue
            try:
                if int(v) >= 2:
                    return 2
            except Exception:
                continue
    except Exception:
        pass
    try:
        kind = jax.devices()[0].device_kind.lower()
        if "v7" in kind:
            return 2
    except Exception:
        pass
    return 1


def _vmem_plan():
    """Returns (input_budget_bytes, vmem_limit_bytes_or_None), chip-dependent."""
    try:
        phys = int(pltpu.get_tpu_info().vmem_capacity_bytes)
    except Exception:
        phys = 0
    if phys >= (128 << 20):      # v5e / v6e: 128 MiB physical -> raise scoped limit
        return 16 << 20, 64 << 20
    if phys >= (64 << 20):       # v7x: 64 MiB per TC, default 32 MiB scoped is enough
        return 16 << 20, None
    # Unknown chip / interpret mode: stay under the smallest default scoped VMEM.
    return 12 << 20, None


def _pick_racc(block_rows):
    """Largest partial-accumulator row count in {64,32,16,8} dividing block_rows."""
    for r in (64, 32, 16, 8):
        if block_rows % r == 0:
            return r
    return 8


def _bce_kernel(x_ref, y_ref, pos_ref, neg_ref, cnt_ref, *,
                blocks_per_core, blocks_total, full_blocks,
                block_rows, racc, rows_last):
    c = pl.program_id(0)          # TensorCore-split axis ("parallel")
    i = pl.program_id(1)          # streaming / reduction axis ("arbitrary")

    @pl.when(i == 0)
    def _init():
        pos_ref[...] = jnp.zeros_like(pos_ref)
        neg_ref[...] = jnp.zeros_like(neg_ref)
        cnt_ref[...] = jnp.zeros_like(cnt_ref)

    x = x_ref[...].astype(jnp.float32)
    y = y_ref[...].astype(jnp.float32)

    # Numerically stable BCE-with-logits (same formula PyTorch uses):
    #   loss = max(x, 0) - x*y + log(1 + exp(-|x|))
    loss = jnp.maximum(x, 0.0) - x * y + jnp.log(1.0 + jnp.exp(-jnp.abs(x)))
    pos = y > 0.0
    neg = y == 0.0

    block_idx = c * blocks_per_core + i          # scalar-unit arithmetic only
    k = block_rows // racc

    def _accumulate(pos_m, neg_m):
        # Select (NaN-safe), fold the block to a small partial with pure VALU
        # vreg adds (leading-axis sum, no XLU), add once into the resident
        # output block.
        pos_ref[...] += jnp.where(pos_m, loss, 0.0).reshape(k, racc, _LANE).sum(axis=0)
        neg_ref[...] += jnp.where(neg_m, loss, 0.0).reshape(k, racc, _LANE).sum(axis=0)
        cnt_ref[...] += jnp.where(pos_m, 1.0, 0.0).reshape(k, racc, _LANE).sum(axis=0)

    # Hot path: full, in-range blocks — no masking arithmetic at all.
    @pl.when(block_idx < full_blocks)
    def _full():
        _accumulate(pos, neg)

    # Cold path: the single ragged trailing row-block (only exists when
    # n_rows % block_rows != 0). Over-provisioned blocks from the core split
    # satisfy neither guard and contribute nothing.
    if full_blocks < blocks_total:
        @pl.when(block_idx == blocks_total - 1)
        def _ragged():
            row = lax.broadcasted_iota(jnp.int32, (block_rows, _LANE), 0)
            rowm = row < rows_last
            _accumulate(jnp.logical_and(pos, rowm), jnp.logical_and(neg, rowm))


def _partial_sums_pallas(x2d, y2d, max_block_rows=None):
    """Runs the kernel on an aligned (n_rows, 128) view; returns partial sums."""
    n_rows = x2d.shape[0]
    itemsize = jnp.dtype(x2d.dtype).itemsize + jnp.dtype(y2d.dtype).itemsize

    input_budget, vmem_limit = _vmem_plan()
    # Double-buffered inputs: 2 buffers x (x block + y block) must fit the budget.
    cap_rows = max(_SUB, ((input_budget // 2) // (_LANE * itemsize)) // _SUB * _SUB)
    if max_block_rows is not None:
        cap_rows = min(cap_rows, max(_SUB, (max_block_rows // _SUB) * _SUB))
    block_rows = min(cap_rows, n_rows)

    racc = _pick_racc(block_rows)
    blocks_total = pl.cdiv(n_rows, block_rows)
    full_blocks = n_rows // block_rows
    rows_last = n_rows - full_blocks * block_rows

    num_cores = _num_tensorcores() if blocks_total > 1 else 1
    blocks_per_core = pl.cdiv(blocks_total, num_cores)
    grid = (num_cores, blocks_per_core)

    def in_map(c, i):
        # Clamp over-provisioned blocks to a valid index (no OOB DMA); the
        # kernel's pl.when guards skip their accumulation.
        return (jnp.minimum(c * blocks_per_core + i, blocks_total - 1), 0)

    out_map = lambda c, i: (c, 0)

    kernel = functools.partial(
        _bce_kernel,
        blocks_per_core=blocks_per_core,
        blocks_total=blocks_total,
        full_blocks=full_blocks,
        block_rows=block_rows,
        racc=racc,
        rows_last=rows_last,
    )

    part_shape = jax.ShapeDtypeStruct((num_cores * racc, _LANE), jnp.float32)

    cp_kwargs = dict(dimension_semantics=("parallel", "arbitrary"))
    if vmem_limit is not None:
        cp_kwargs["vmem_limit_bytes"] = vmem_limit

    pos, neg, cnt = pl.pallas_call(
        kernel,
        out_shape=(part_shape, part_shape, part_shape),
        grid=grid,
        in_specs=[
            pl.BlockSpec((block_rows, _LANE), in_map),
            pl.BlockSpec((block_rows, _LANE), in_map),
        ],
        out_specs=(
            pl.BlockSpec((racc, _LANE), out_map),
            pl.BlockSpec((racc, _LANE), out_map),
            pl.BlockSpec((racc, _LANE), out_map),
        ),
        compiler_params=pltpu.CompilerParams(**cp_kwargs),
    )(x2d, y2d)

    # Final cross-lane sums are trivial and done by XLA in the wrapper.
    return jnp.sum(pos), jnp.sum(neg), jnp.sum(cnt)


def bce_loss(output, label, *, max_block_rows=None):
    """Reproduces cvpr22/vpd BCE_Loss.forward(output, label).

    Returns (loss_pos, loss_neg), each a shape-(1,) float32 array."""
    n_elements = int(output.size)    # label.nelement() in the PyTorch code

    x = jnp.ravel(output)            # keep original dtype; cast in-kernel
    y = jnp.ravel(label)

    n_main = (n_elements // _TILE) * _TILE
    rem = n_elements - n_main

    sum_pos = jnp.zeros((), jnp.float32)
    sum_neg = jnp.zeros((), jnp.float32)
    cnt_pos = jnp.zeros((), jnp.float32)

    if n_main:
        x2d = x[:n_main].reshape(n_main // _LANE, _LANE)
        y2d = y[:n_main].reshape(n_main // _LANE, _LANE)
        sp, sn, cp_ = _partial_sums_pallas(x2d, y2d, max_block_rows)
        sum_pos = sum_pos + sp
        sum_neg = sum_neg + sn
        cnt_pos = cnt_pos + cp_

    if rem:
        # <1024-element ragged tail handled with plain jnp — avoids a full-tensor
        # pad/copy and any per-block tail masking in the kernel.
        xt = x[n_main:].astype(jnp.float32)
        yt = y[n_main:].astype(jnp.float32)
        lt = jnp.maximum(xt, 0.0) - xt * yt + jnp.log1p(jnp.exp(-jnp.abs(xt)))
        pm = yt > 0.0
        nm = yt == 0.0
        sum_pos = sum_pos + jnp.sum(jnp.where(pm, lt, 0.0))
        sum_neg = sum_neg + jnp.sum(jnp.where(nm, lt, 0.0))
        cnt_pos = cnt_pos + jnp.sum(pm.astype(jnp.float32))

    # Matches PyTorch semantics: no zero-guard on cnt_pos (inf/nan if there are
    # no positive labels); soft labels in (0,1) fall into neither bucket.
    loss_pos = sum_pos / cnt_pos
    loss_neg = sum_neg / (jnp.float32(n_elements) - cnt_pos)
    return loss_pos[None], loss_neg[None]


def _bce_loss_ref(output, label):
    """Pure-JAX reference mirroring the PyTorch module, for sanity checking."""
    x = jnp.ravel(output).astype(jnp.float32)
    y = jnp.ravel(label).astype(jnp.float32)
    loss = jnp.maximum(x, 0.0) - x * y + jnp.log1p(jnp.exp(-jnp.abs(x)))
    pos = y > 0.0
    neg = y == 0.0
    cnt_pos = jnp.sum(pos.astype(jnp.float32))
    loss_pos = jnp.sum(jnp.where(pos, loss, 0.0)) / cnt_pos
    loss_neg = jnp.sum(jnp.where(neg, loss, 0.0)) / (x.size - cnt_pos)
    return loss_pos[None], loss_neg[None]


if __name__ == "__main__":
    key = jax.random.PRNGKey(0)
    k1, k2, k3, k4, k5, k6 = jax.random.split(key, 6)

    # Module has no parameters (nn.BCEWithLogitsLoss only).

    # Case 1: NCHW-like logits/labels, size divisible by 8*128 (pure kernel path).
    shape1 = (2, 4, 16, 16)
    logits1 = jax.random.normal(k1, shape1, dtype=jnp.float32)
    labels1 = jax.random.bernoulli(k2, p=0.3, shape=shape1).astype(jnp.float32)
    lp1, ln1 = bce_loss(logits1, labels1)
    jax.block_until_ready((lp1, ln1))
    rp1, rn1 = _bce_loss_ref(logits1, labels1)
    assert lp1.shape == (1,) and ln1.shape == (1,)
    assert jnp.allclose(lp1, rp1, rtol=1e-4, atol=1e-5)
    assert jnp.allclose(ln1, rn1, rtol=1e-4, atol=1e-5)

    # Case 2: ragged element count (not a multiple of 1024) -> wrapper tail path.
    shape2 = (3, 5, 17, 13)
    logits2 = jax.random.normal(k3, shape2, dtype=jnp.float32)
    labels2 = jax.random.bernoulli(k4, p=0.3, shape=shape2).astype(jnp.float32)
    lp2, ln2 = bce_loss(logits2, labels2)
    jax.block_until_ready((lp2, ln2))
    rp2, rn2 = _bce_loss_ref(logits2, labels2)
    assert jnp.allclose(lp2, rp2, rtol=1e-4, atol=1e-5)
    assert jnp.allclose(ln2, rn2, rtol=1e-4, atol=1e-5)

    # Case 3: force small blocks to exercise multi-block streaming, the ragged
    # trailing row-block, the core-split guard and the clamped index_map.
    shape3 = (4, 8, 32, 32)
    logits3 = jax.random.normal(k5, shape3, dtype=jnp.float32)
    labels3 = jax.random.bernoulli(k6, p=0.3, shape=shape3).astype(jnp.float32)
    lp3, ln3 = bce_loss(logits3, labels3, max_block_rows=40)
    jax.block_until_ready((lp3, ln3))
    rp3, rn3 = _bce_loss_ref(logits3, labels3)
    assert jnp.allclose(lp3, rp3, rtol=1e-4, atol=1e-5)
    assert jnp.allclose(ln3, rn3, rtol=1e-4, atol=1e-5)

    print("KERNEL_OK")
</pallas_src>

<mosaic_0001>
module attributes {stable_mosaic.version = 11 : i64} {
  func.func @_bce_kernel(%arg0: i32, %arg1: i32, %arg2: memref<16x128xf32, #tpu.memory_space<vmem>>, %arg3: memref<16x128xf32, #tpu.memory_space<vmem>>, %arg4: memref<16x128xf32, #tpu.memory_space<vmem>>, %arg5: memref<16x128xf32, #tpu.memory_space<vmem>>, %arg6: memref<16x128xf32, #tpu.memory_space<vmem>>) attributes {dimension_semantics = [#tpu.dimension_semantics<parallel>, #tpu.dimension_semantics<arbitrary>], iteration_bounds = array<i64: 1, 1>, scalar_prefetch = 0 : i64, scratch_operands = 0 : i64, tpu.core_type = #tpu.core_type<tc>, window_params = [{transform_indices = @transform_0, window_bounds = array<i64: 16, 128>}, {transform_indices = @transform_1, window_bounds = array<i64: 16, 128>}, {transform_indices = @transform_2, window_bounds = array<i64: 16, 128>}, {transform_indices = @transform_3, window_bounds = array<i64: 16, 128>}, {transform_indices = @transform_4, window_bounds = array<i64: 16, 128>}]} {
    %c0_i32 = arith.constant 0 : i32
    %0 = arith.cmpi eq, %arg1, %c0_i32 : i32
    %1 = arith.extui %0 : i1 to i32
    %c0_i32_0 = arith.constant 0 : i32
    %2 = arith.cmpi ne, %1, %c0_i32_0 : i32
    scf.if %2 {
      %cst_10 = arith.constant 0.000000e+00 : f32
      %26 = vector.broadcast %cst_10 : f32 to vector<16x128xf32>
      %c0_11 = arith.constant 0 : index
      %c0_12 = arith.constant 0 : index
      %27 = vector.load %arg4[%c0_11, %c0_12] : memref<16x128xf32, #tpu.memory_space<vmem>>, vector<16x128xf32>
      tpu.vector_store %arg4[%c0_11, %c0_12], %26 {strides = array<i32>} : memref<16x128xf32, #tpu.memory_space<vmem>>, vector<16x128xf32>,
      %cst_13 = arith.constant 0.000000e+00 : f32
      %28 = vector.broadcast %cst_13 : f32 to vector<16x128xf32>
      %c0_14 = arith.constant 0 : index
      %c0_15 = arith.constant 0 : index
      %29 = vector.load %arg5[%c0_14, %c0_15] : memref<16x128xf32, #tpu.memory_space<vmem>>, vector<16x128xf32>
      tpu.vector_store %arg5[%c0_14, %c0_15], %28 {strides = array<i32>} : memref<16x128xf32, #tpu.memory_space<vmem>>, vector<16x128xf32>,
      %cst_16 = arith.constant 0.000000e+00 : f32
      %30 = vector.broadcast %cst_16 : f32 to vector<16x128xf32>
      %c0_17 = arith.constant 0 : index
      %c0_18 = arith.constant 0 : index
      %31 = vector.load %arg6[%c0_17, %c0_18] : memref<16x128xf32, #tpu.memory_space<vmem>>, vector<16x128xf32>
      tpu.vector_store %arg6[%c0_17, %c0_18], %30 {strides = array<i32>} : memref<16x128xf32, #tpu.memory_space<vmem>>, vector<16x128xf32>,
    } else {
    }
    %c0 = arith.constant 0 : index
    %c0_1 = arith.constant 0 : index
    %3 = vector.load %arg2[%c0, %c0_1] : memref<16x128xf32, #tpu.memory_space<vmem>>, vector<16x128xf32>
    %c0_2 = arith.constant 0 : index
    %c0_3 = arith.constant 0 : index
    %4 = vector.load %arg3[%c0_2, %c0_3] : memref<16x128xf32, #tpu.memory_space<vmem>>, vector<16x128xf32>
    %cst = arith.constant 0.000000e+00 : f32
    %5 = vector.broadcast %cst : f32 to vector<16x128xf32>
    %6 = arith.maximumf %3, %5 : vector<16x128xf32>
    %7 = arith.mulf %3, %4 : vector<16x128xf32>
    %8 = arith.subf %6, %7 : vector<16x128xf32>
    %9 = math.absf %3 : vector<16x128xf32>
    %cst_4 = arith.constant 0.000000e+00 : f32
    %10 = vector.broadcast %cst_4 : f32 to vector<16x128xf32>
    %11 = arith.subf %10, %9 : vector<16x128xf32>
    %12 = math.exp %11 : vector<16x128xf32>
    %cst_5 = arith.constant 1.000000e+00 : f32
    %13 = vector.broadcast %cst_5 : f32 to vector<16x128xf32>
    %14 = arith.addf %13, %12 : vector<16x128xf32>
    %15 = math.log %14 : vector<16x128xf32>
    %16 = arith.addf %8, %15 : vector<16x128xf32>
    %cst_6 = arith.constant 0.000000e+00 : f32
    %17 = vector.broadcast %cst_6 : f32 to vector<16x128xf32>
    %18 = arith.cmpf ogt, %4, %17 : vector<16x128xf32>
    %cst_7 = arith.constant 0.000000e+00 : f32
    %19 = vector.broadcast %cst_7 : f32 to vector<16x128xf32>
    %20 = arith.cmpf oeq, %4, %19 : vector<16x128xf32>
    %c1_i32 = arith.constant 1 : i32
    %21 = arith.muli %arg0, %c1_i32 : i32
    %22 = arith.addi %21, %arg1 : i32
    %c1_i32_8 = arith.constant 1 : i32
    %23 = arith.cmpi slt, %22, %c1_i32_8 : i32
    %24 = arith.extui %23 : i1 to i32
    %c0_i32_9 = arith.constant 0 : i32
    %25 = arith.cmpi ne, %24, %c0_i32_9 : i32
    scf.if %25 {
      %c0_10 = arith.constant 0 : index
      %c0_11 = arith.constant 0 : index
      %26 = vector.load %arg4[%c0_10, %c0_11] : memref<16x128xf32, #tpu.memory_space<vmem>>, vector<16x128xf32>
      %cst_12 = arith.constant 0.000000e+00 : f32
      %27 = vector.broadcast %cst_12 : f32 to vector<16x128xf32>
      %28 = arith.select %18, %16, %27 : vector<16x128xi1>, vector<16x128xf32>
      %29 = vector.shape_cast %28 : vector<16x128xf32> to vector<1x16x128xf32>
      %cst_13 = arith.constant dense<0.000000e+00> : vector<16x128xf32>
      %30 = vector.multi_reduction <add>, %29, %cst_13 [0] : vector<1x16x128xf32> to vector<16x128xf32>
      %31 = arith.addf %26, %30 : vector<16x128xf32>
      %c0_14 = arith.constant 0 : index
      %c0_15 = arith.constant 0 : index
      %32 = vector.load %arg4[%c0_14, %c0_15] : memref<16x128xf32, #tpu.memory_space<vmem>>, vector<16x128xf32>
      tpu.vector_store %arg4[%c0_14, %c0_15], %31 {strides = array<i32>} : memref<16x128xf32, #tpu.memory_space<vmem>>, vector<16x128xf32>,
      %c0_16 = arith.constant 0 : index
      %c0_17 = arith.constant 0 : index
      %33 = vector.load %arg5[%c0_16, %c0_17] : memref<16x128xf32, #tpu.memory_space<vmem>>, vector<16x128xf32>
      %cst_18 = arith.constant 0.000000e+00 : f32
      %34 = vector.broadcast %cst_18 : f32 to vector<16x128xf32>
      %35 = arith.select %20, %16, %34 : vector<16x128xi1>, vector<16x128xf32>
      %36 = vector.shape_cast %35 : vector<16x128xf32> to vector<1x16x128xf32>
      %cst_19 = arith.constant dense<0.000000e+00> : vector<16x128xf32>
      %37 = vector.multi_reduction <add>, %36, %cst_19 [0] : vector<1x16x128xf32> to vector<16x128xf32>
      %38 = arith.addf %33, %37 : vector<16x128xf32>
      %c0_20 = arith.constant 0 : index
      %c0_21 = arith.constant 0 : index
      %39 = vector.load %arg5[%c0_20, %c0_21] : memref<16x128xf32, #tpu.memory_space<vmem>>, vector<16x128xf32>
      tpu.vector_store %arg5[%c0_20, %c0_21], %38 {strides = array<i32>} : memref<16x128xf32, #tpu.memory_space<vmem>>, vector<16x128xf32>,
      %c0_22 = arith.constant 0 : index
      %c0_23 = arith.constant 0 : index
      %40 = vector.load %arg6[%c0_22, %c0_23] : memref<16x128xf32, #tpu.memory_space<vmem>>, vector<16x128xf32>
      %cst_24 = arith.constant 1.000000e+00 : f32
      %cst_25 = arith.constant 0.000000e+00 : f32
      %41 = vector.broadcast %cst_24 : f32 to vector<16x128xf32>
      %42 = vector.broadcast %cst_25 : f32 to vector<16x128xf32>
      %43 = arith.select %18, %41, %42 : vector<16x128xi1>, vector<16x128xf32>
      %44 = vector.shape_cast %43 : vector<16x128xf32> to vector<1x16x128xf32>
      %cst_26 = arith.constant dense<0.000000e+00> : vector<16x128xf32>
      %45 = vector.multi_reduction <add>, %44, %cst_26 [0] : vector<1x16x128xf32> to vector<16x128xf32>
      %46 = arith.addf %40, %45 : vector<16x128xf32>
      %c0_27 = arith.constant 0 : index
      %c0_28 = arith.constant 0 : index
      %47 = vector.load %arg6[%c0_27, %c0_28] : memref<16x128xf32, #tpu.memory_space<vmem>>, vector<16x128xf32>
      tpu.vector_store %arg6[%c0_27, %c0_28], %46 {strides = array<i32>} : memref<16x128xf32, #tpu.memory_space<vmem>>, vector<16x128xf32>,
    } else {
    }
    return
  }
  func.func @transform_0(%arg0: i32, %arg1: i32) -> (i32, i32) {
    %c1_i32 = arith.constant 1 : i32
    %0 = arith.muli %arg0, %c1_i32 : i32
    %1 = arith.addi %0, %arg1 : i32
    %c0_i32 = arith.constant 0 : i32
    %2 = arith.minsi %1, %c0_i32 : i32
    %c0_i32_0 = arith.constant 0 : i32
    %c0_i32_1 = arith.constant 0 : i32
    return %2, %c0_i32_0 : i32, i32
  }
  func.func @transform_1(%arg0: i32, %arg1: i32) -> (i32, i32) {
    %c1_i32 = arith.constant 1 : i32
    %0 = arith.muli %arg0, %c1_i32 : i32
    %1 = arith.addi %0, %arg1 : i32
    %c0_i32 = arith.constant 0 : i32
    %2 = arith.minsi %1, %c0_i32 : i32
    %c0_i32_0 = arith.constant 0 : i32
    %c0_i32_1 = arith.constant 0 : i32
    return %2, %c0_i32_0 : i32, i32
  }
  func.func @transform_2(%arg0: i32, %arg1: i32) -> (i32, i32) {
    %c0_i32 = arith.constant 0 : i32
    %c0_i32_0 = arith.constant 0 : i32
    return %arg0, %c0_i32 : i32, i32
  }
  func.func @transform_3(%arg0: i32, %arg1: i32) -> (i32, i32) {
    %c0_i32 = arith.constant 0 : i32
    %c0_i32_0 = arith.constant 0 : i32
    return %arg0, %c0_i32 : i32, i32
  }
  func.func @transform_4(%arg0: i32, %arg1: i32) -> (i32, i32) {
    %c0_i32 = arith.constant 0 : i32
    %c0_i32_0 = arith.constant 0 : i32
    return %arg0, %c0_i32 : i32, i32
  }
}

</mosaic_0001>

<bundles_post_ra>
// kernel: tpu_custom_call.1
= control target key start
LH: loop header
LB: loop body
LE: loop exit
PB: predicated region body
PF: predicated region fallthrough
CT: control target
= control target key end

     0   :  { %10 = vsyncpa [#allocation3], 0  ;;  %s383_s0 = inlined_call_operand.hbm [shape: f32[16,128], index: 0, kind: input, shape index: {}]   ;;  %s384_s1 = inlined_call_operand.hbm [shape: f32[16,128], index: 1, kind: input, shape index: {}]   ;;  %s385_s2 = inlined_call_operand.hbm [shape: f32[16,128], index: 2, kind: output, shape index: {0}]   ;;  %s386_s3 = inlined_call_operand.hbm [shape: f32[16,128], index: 3, kind: output, shape index: {1}]   ;;  %s387_s4 = inlined_call_operand.hbm [shape: f32[16,128], index: 4, kind: output, shape index: {2}]  }
   0x1   :  { %11 = vsyncpa [#allocation6], 0 }
   0x2   :  { %12 = vsyncpa [#allocation4], 0 }
   0x3   :  { %13 = vsyncpa [#allocation9], 0  ;;  %s316_s15 = smov [#allocation2]  }
   0x4   :  { %s25_s16 = sshll.u32 %s316_s15, 4  ;;  %s26_s16 = int_to_ptr.vmem [resolvable:$true] %s25_s16 }
   0x5   :  { %s216_s17 = scalar_lea.vmem %s26_s16, 256  ;;  %p221_p1 = scmp.lt.s32.totalorder %s26_s16, %s26_s16 }
   0x6   :  { %p217_p0 = scmp.ne.s32.totalorder %s26_s16, %s216_s17  ;;  %p222_p2 = scmp.lt.s32.totalorder %s216_s17, %s216_s17 }
   0x8   :  { %p223_p3 = por %p222_p2, %p221_p1 }
   0xa   :  { %p224_p4 = pnand %p223_p3, %p217_p0 }
   0xc   :  { %227 = shalt.err (!%p224_p4)
}
   0xd   :  { %s317_s18 = smov 128   ;;  %s318_s19 = smov 8  }
   0xe   :  { %31 = dma.hbm_to_vmem [thread:$0]  %s383_s0, 256, %s26_s16, [#allocation3], %s317_s18, %s317_s18, %s318_s19  }
   0xf   :  { %s319_s22 = smov [#allocation5]  }
  0x10   :  { %s43_s23 = sshll.u32 %s319_s22, 4  ;;  %s44_s23 = int_to_ptr.vmem [resolvable:$true] %s43_s23 }
  0x11   :  { %s236_s24 = scalar_lea.vmem %s44_s23, 256  ;;  %p241_p6 = scmp.lt.s32.totalorder %s44_s23, %s44_s23 }
  0x12   :  { %p237_p5 = scmp.ne.s32.totalorder %s44_s23, %s236_s24  ;;  %p242_p7 = scmp.lt.s32.totalorder %s236_s24, %s236_s24 }
  0x14   :  { %p243_p8 = por %p242_p7, %p241_p6 }
  0x16   :  { %p244_p9 = pnand %p243_p8, %p237_p5 }
  0x18   :  { %247 = shalt.err (!%p244_p9)
}
  0x19   :  { %49 = dma.hbm_to_vmem [thread:$0]  %s384_s1, 256, %s44_s23, [#allocation6], %s317_s18, %s317_s18, %s318_s19  }
  0x1a   :  { %308 = dma.done.wait [#allocation3], 256  }
  0x1b   :  { %309 = vsyncadd [#allocation3], 4294967040 }
  0x1c   :  { %310 = dma.done.wait [#allocation6], 256  }
  0x1d   :  { %311 = vsyncadd [#allocation6], 4294967040  ;;  %v74_v0 = vld [vmem:[#allocation2] sm:$0xff]  ;;  %v75_v1 = vld [vmem:[#allocation2 + $0x8] sm:$0xff]  ;;  %v320_v8 = vmov 0.0   ;;  %s321_s0 = smov [#allocation8]  }
  0x1e   :  { %v84_v2 = vand.u32 2147483647, %v74_v0  ;;  %v76_v3 = vld [vmem:[#allocation5] sm:$0xff]  ;;  %v77_v4 = vld [vmem:[#allocation5 + $0x8] sm:$0xff]  ;;  %v85_v5 = vand.u32 2147483647, %v75_v1 }
  0x1f   :  { %vm100_vm0 = vcmp.gt.f32.partialorder %v76_v3, 0.0  ;;  %vm101_vm1 = vcmp.gt.f32.partialorder %v77_v4, 0.0  ;;  %v78_v17 = vmax.f32 %v74_v0, 0.0  ;;  %v80_v18 = vmul.f32 %v76_v3, %v74_v0  ;;  %s156_s1 = sshll.u32 %s321_s0, 4  ;;  %s322_s27 = smov [#allocation7]   ;;  %s157_s1 = int_to_ptr.vmem [resolvable:$true] %s156_s1 }
  0x20   :  { %v86_v6 = vsub.f32 0.0, %v84_v2  ;;  %v87_v7 = vsub.f32 0.0, %v85_v5  ;;  %v131_v9 = vsel %vm100_vm0, 1.0, %v320_v8  ;;  %v132_v10 = vsel %vm101_vm1, 1.0, %v320_v8  ;;  %s144_s28 = sshll.u32 %s322_s27, 4  ;;  %s323_s29 = smov [#allocation10]   ;;  %s145_s28 = int_to_ptr.vmem [resolvable:$true] %s144_s28 }
  0x21   :  { %137 = vst [vmem:[#allocation10] sm:$0xff] %v131_v9  ;;  %138 = vst [vmem:[#allocation10 + $0x8] sm:$0xff] %v132_v10  ;;  %v79_v19 = vmax.f32 %v75_v1, 0.0  ;;  %v81_v20 = vmul.f32 %v77_v4, %v75_v1  ;;  %v82_v21 = vsub.f32 %v78_v17, %v80_v18  ;;  %vm102_vm2 = vcmp.eq.f32.partialorder %v76_v3, 0.0  ;;  %s168_s30 = sshll.u32 %s323_s29, 4  ;;  %s248_s5 = scalar_lea.vmem %s157_s1, 256  ;;  %s169_s30 = int_to_ptr.vmem [resolvable:$true] %s168_s30 }
  0x22   :  { %v88_v11 = vmul.f32 1.442695, %v86_v6  ;;  %v90_v12 = vmul.f32 1.442695, %v87_v7  ;;  %vm103_vm3 = vcmp.eq.f32.partialorder %v77_v4, 0.0  ;;  %p249_p10 = scmp.ne.s32.totalorder %s157_s1, %s248_s5  ;;  %p253_p11 = scmp.lt.s32.totalorder %s157_s1, %s157_s1 }
  0x23   :  { %v83_v23 = vsub.f32 %v79_v19, %v81_v20  ;;  %p254_p12 = scmp.lt.s32.totalorder %s248_s5, %s248_s5 }
  0x24   :  { %200 = vpow2.f32 %v88_v11 }
  0x25   :  { %202 = vpow2.f32 %v90_v12  ;;  %p255_p13 = por %p254_p12, %p253_p11 }
  0x27   :  { %p256_p0 = pnand %p255_p13, %p249_p10 }
  0x31   :  { %v201_v13 = vpop.eup %200 }
  0x32   :  { %v203_v14 = vpop.eup %202  ;;  %v92_v15 = vadd.f32 1.0, %v201_v13 }
  0x33   :  { %v93_v16 = vadd.f32 1.0, %v203_v14 }
  0x34   :  { %204 = vlog2.f32 %v92_v15 }
  0x35   :  { %206 = vlog2.f32 %v93_v16 }
  0x41   :  { %v205_v22 = vpop.eup %204 }
  0x42   :  { %v207_v24 = vpop.eup %206  ;;  %v95_v25 = vmul.f32 0.6931472, %v205_v22 }
  0x43   :  { %v97_v26 = vmul.f32 0.6931472, %v207_v24 }
  0x44   :  { %v98_v27 = vadd.f32 %v95_v25, %v82_v21 }
  0x45   :  { %v99_v28 = vadd.f32 %v97_v26, %v83_v23 }
  0x46   :  { %v121_v29 = vsel %vm102_vm2, %v98_v27, 0.0  ;;  %v111_v30 = vsel %vm100_vm0, %v98_v27, 0.0 }
  0x47   :  { %v122_v31 = vsel %vm103_vm3, %v99_v28, 0.0  ;;  %v112_v32 = vsel %vm101_vm1, %v99_v28, 0.0  ;;  %127 = vst [vmem:[#allocation8] sm:$0xff] %v121_v29  ;;  %117 = vst [vmem:[#allocation7] sm:$0xff] %v111_v30 }
  0x48   :  { %128 = vst [vmem:[#allocation8 + $0x8] sm:$0xff] %v122_v31  ;;  %118 = vst [vmem:[#allocation7 + $0x8] sm:$0xff] %v112_v32 }
  0x49   :  { %259 = shalt.err (!%p256_p0)
}
  0x4a   :  { %162 = dma.vmem_to_hbm [thread:$0]  %s157_s1, 256, %s386_s3, [#allocation9], %s317_s18, %s317_s18, %s318_s19  }
  0x4b   :  { %s268_s8 = scalar_lea.vmem %s145_s28, 256  ;;  %p273_p2 = scmp.lt.s32.totalorder %s145_s28, %s145_s28 }
  0x4c   :  { %p269_p1 = scmp.ne.s32.totalorder %s145_s28, %s268_s8  ;;  %p274_p3 = scmp.lt.s32.totalorder %s268_s8, %s268_s8 }
  0x4e   :  { %p275_p4 = por %p274_p3, %p273_p2 }
  0x50   :  { %p276_p5 = pnand %p275_p4, %p269_p1 }
  0x52   :  { %279 = shalt.err (!%p276_p5)
}
  0x53   :  { %150 = dma.vmem_to_hbm [thread:$0]  %s145_s28, 256, %s385_s2, [#allocation4], %s317_s18, %s317_s18, %s318_s19  }
  0x54   :  { %s288_s11 = scalar_lea.vmem %s169_s30, 256  ;;  %p293_p7 = scmp.lt.s32.totalorder %s169_s30, %s169_s30 }
  0x55   :  { %p289_p6 = scmp.ne.s32.totalorder %s169_s30, %s288_s11  ;;  %p294_p8 = scmp.lt.s32.totalorder %s288_s11, %s288_s11 }
  0x57   :  { %p295_p9 = por %p294_p8, %p293_p7 }
  0x59   :  { %p296_p10 = pnand %p295_p9, %p289_p6 }
  0x5b   :  { %299 = shalt.err (!%p296_p10)
}
  0x5c   :  { %174 = dma.vmem_to_hbm [thread:$0]  %s169_s30, 256, %s387_s4, [#allocation9], %s317_s18, %s317_s18, %s318_s19  }
  0x5d   :  { %312 = dma.done.wait [#allocation4], 256  }
  0x5e   :  { %313 = vsyncadd [#allocation4], 4294967040 }
  0x5f   :  { %314 = dma.done.wait [#allocation9], 512  }
  0x60   :  { %315 = vsyncadd [#allocation9], 4294966784 }
  0x61   :  { %184 = vsyncpa [#allocation3], 1 }
  0x62   :  { %185 = vsyncpa [#allocation6], 1 }
  0x63   :  { %186 = vsyncpa [#allocation4], 1 }
  0x64   :  { %187 = vsyncpa [#allocation9], 1 }

</bundles_post_ra>
